<compile_context>
chip_gen: v6e
topology: v6e:2x2x1
jax: 0.10.0
libtpu: 0.0.40
codegen_flags: <defaults>
</compile_context>

<pallas_src>
import functools

import jax
import jax.numpy as jnp
from jax.experimental import pallas as pl
from jax.experimental.pallas import tpu as pltpu


def _round_up(x, m):
    return ((x + m - 1) // m) * m


# --------------------------------------------------------------------------- #
# Kernels
# --------------------------------------------------------------------------- #

def _dnn_resident_kernel(x_ref, w_ref, b_ref, wo_ref, bo_ref, o_ref, *,
                         num_layers, residual):
    """Batch-tile kernel; all weights VMEM-resident (single-buffered).

    x_ref : (TB, Dp)      f32   padded, flattened input tile
    w_ref : (L, Dp, Dp)   bf16  hidden weights (y = x @ W)
    b_ref : (L, 1, Dp)    f32   hidden biases
    wo_ref: (Dp, Dh_pad)  bf16  output weights (lane-dense padded)
    bo_ref: (1, Dh_pad)   f32   output bias
    o_ref : (TB, Dh_pad)  f32   output tile
    """
    h = x_ref[...]
    # Static unroll: w_ref[l] is a zero-cost static slice of the resident tile.
    # TODO(synk): for very deep stacks (>~4 layers) prefer the streamed path.
    for l in range(num_layers):
        z = jnp.dot(h.astype(jnp.bfloat16), w_ref[l],
                    preferred_element_type=jnp.float32) + b_ref[l]
        a = jnp.maximum(z, 0.0)
        h = a + h if residual else a
    o_ref[...] = jnp.dot(h.astype(jnp.bfloat16), wo_ref[...],
                         preferred_element_type=jnp.float32) + bo_ref[...]


def _dnn_streamed_kernel(x_ref, w_ref, b_ref, wo_ref, bo_ref, o_ref, h_ref, *,
                         residual):
    """Layer-streamed kernel: grid = (batch_tiles, num_layers).

    One (Dp, Dp) bf16 weight is DMA'd per grid step (overlapping the previous
    layer's matmul); the activation carry lives in a VMEM scratch, so weight
    residency stays ~2 * Dp^2 * 2B regardless of num_layers.
    """
    l = pl.program_id(1)

    @pl.when(l == 0)
    def _():
        h_ref[...] = x_ref[...]

    h = h_ref[...]
    z = jnp.dot(h.astype(jnp.bfloat16), w_ref[0],
                preferred_element_type=jnp.float32) + b_ref[0]
    a = jnp.maximum(z, 0.0)
    h_new = a + h if residual else a
    h_ref[...] = h_new

    @pl.when(l == pl.num_programs(1) - 1)
    def _():
        o_ref[...] = jnp.dot(h_new.astype(jnp.bfloat16), wo_ref[...],
                             preferred_element_type=jnp.float32) + bo_ref[...]


# --------------------------------------------------------------------------- #
# Parameter packing (one-time, hoisted out of the per-call jit)
# --------------------------------------------------------------------------- #

def pack_params(params, *, hidden_dim):
    """Pad weights to lane-dense (multiple-of-128) dims and cast to bf16."""
    w_h, b_h, wo, bo = params
    _, _, D = w_h.shape
    Dp = _round_up(D, 128)
    dh_pad = _round_up(hidden_dim, 128)
    w_h = jnp.pad(w_h.astype(jnp.float32),
                  ((0, 0), (0, Dp - D), (0, Dp - D))).astype(jnp.bfloat16)
    b_h = jnp.pad(b_h.astype(jnp.float32), ((0, 0), (0, 0), (0, Dp - D)))
    wo = jnp.pad(wo.astype(jnp.float32),
                 ((0, Dp - D), (0, dh_pad - hidden_dim))).astype(jnp.bfloat16)
    bo = jnp.pad(bo.astype(jnp.float32), ((0, 0), (0, dh_pad - hidden_dim)))
    # TODO(synk): on v5e/v6e, int8 per-channel weight quantization would halve
    # weight HBM traffic again (not drop-in on v7x: fp8-only MXU).
    return (w_h, b_h, wo, bo)


# --------------------------------------------------------------------------- #
# Forward
# --------------------------------------------------------------------------- #

@functools.partial(jax.jit,
                   static_argnames=("hidden_dim", "num_layers", "residual",
                                    "stream_layers"))
def dnn_forward(x, packed, *, hidden_dim, num_layers=2, residual=True,
                stream_layers=None):
    """Pallas DNN.forward: (B, n_attributes, embedding_dim) -> (B, hidden_dim)."""
    b, m, d = x.shape
    D = m * d
    w_h, b_h, wo, bo = packed
    Dp = w_h.shape[-1]
    dh_pad = wo.shape[-1]
    assert w_h.shape[0] == num_layers and Dp >= D and dh_pad >= hidden_dim

    # Flatten and pad the feature dim to the packed (lane-dense) width.
    h0 = x.reshape(b, D).astype(jnp.float32)
    if Dp != D:
        h0 = jnp.pad(h0, ((0, 0), (0, Dp - D)))

    # Batch tiling: balanced tiles (minimal padding), <=256 rows per tile, and
    # at least 2 tiles when b >= 16 so "parallel" shards across both v7x cores.
    min_tiles = 2 if b >= 16 else 1
    n_tiles = max(min_tiles, -(-b // 256))
    tb = _round_up(-(-b // n_tiles), 8)
    b_pad = n_tiles * tb
    if b_pad != b:
        h0 = jnp.pad(h0, ((0, b_pad - b), (0, 0)))

    # VMEM budget near the physical cap (this kernel owns the core).
    try:
        vmem_cap = int(pltpu.get_tpu_info().vmem_capacity_bytes)
    except Exception:
        vmem_cap = 64 << 20
    vmem_limit = max(32 << 20, min(vmem_cap - (8 << 20), 128 << 20))

    # Path choice: keep all weights resident (single-buffered) while they fit;
    # otherwise stream one layer weight per grid step.
    resident_w_bytes = ((num_layers * Dp * Dp + Dp * dh_pad) * 2
                        + num_layers * Dp * 4 + dh_pad * 4)
    act_bytes = 2 * 2 * tb * (Dp + dh_pad) * 4          # dbl-buffered in/out
    if stream_layers is None:
        stream_layers = resident_w_bytes + act_bytes > (vmem_limit * 3) // 4

    flops = 2 * b_pad * Dp * (num_layers * Dp + dh_pad)
    bytes_accessed = (b_pad * Dp * 4 + b_pad * dh_pad * 4
                      + num_layers * Dp * Dp * 2 + num_layers * Dp * 4
                      + Dp * dh_pad * 2 + dh_pad * 4)
    cost = pl.CostEstimate(flops=int(flops), transcendentals=0,
                           bytes_accessed=int(bytes_accessed))

    if not stream_layers:
        kernel = functools.partial(_dnn_resident_kernel,
                                   num_layers=num_layers, residual=residual)
        out = pl.pallas_call(
            kernel,
            out_shape=jax.ShapeDtypeStruct((b_pad, dh_pad), jnp.float32),
            grid=(n_tiles,),
            in_specs=[
                pl.BlockSpec((tb, Dp), lambda i: (i, 0)),          # activations
                # Constant index maps -> fetched once; Buffered(1) removes the
                # pointless second buffer for weights that never change.
                pl.BlockSpec((num_layers, Dp, Dp), lambda i: (0, 0, 0),
                             pipeline_mode=pl.Buffered(1)),
                pl.BlockSpec((num_layers, 1, Dp), lambda i: (0, 0, 0),
                             pipeline_mode=pl.Buffered(1)),
                pl.BlockSpec((Dp, dh_pad), lambda i: (0, 0),
                             pipeline_mode=pl.Buffered(1)),
                pl.BlockSpec((1, dh_pad), lambda i: (0, 0),
                             pipeline_mode=pl.Buffered(1)),
            ],
            out_specs=pl.BlockSpec((tb, dh_pad), lambda i: (i, 0)),
            compiler_params=pltpu.CompilerParams(
                dimension_semantics=("parallel",),
                vmem_limit_bytes=vmem_limit),
            cost_estimate=cost,
        )(h0, w_h, b_h, wo, bo)
    else:
        kernel = functools.partial(_dnn_streamed_kernel, residual=residual)
        out = pl.pallas_call(
            kernel,
            out_shape=jax.ShapeDtypeStruct((b_pad, dh_pad), jnp.float32),
            grid=(n_tiles, num_layers),
            in_specs=[
                pl.BlockSpec((tb, Dp), lambda i, l: (i, 0)),
                pl.BlockSpec((1, Dp, Dp), lambda i, l: (l, 0, 0)),  # streamed W
                pl.BlockSpec((1, 1, Dp), lambda i, l: (l, 0, 0)),
                pl.BlockSpec((Dp, dh_pad), lambda i, l: (0, 0),
                             pipeline_mode=pl.Buffered(1)),
                pl.BlockSpec((1, dh_pad), lambda i, l: (0, 0),
                             pipeline_mode=pl.Buffered(1)),
            ],
            out_specs=pl.BlockSpec((tb, dh_pad), lambda i, l: (i, 0)),
            scratch_shapes=[pltpu.VMEM((tb, Dp), jnp.float32)],
            compiler_params=pltpu.CompilerParams(
                dimension_semantics=("parallel", "arbitrary"),
                vmem_limit_bytes=vmem_limit),
            cost_estimate=cost,
        )(h0, w_h, b_h, wo, bo)

    return out[:b, :hidden_dim]


# --------------------------------------------------------------------------- #
# Init + reference
# --------------------------------------------------------------------------- #

def init_params(key, D, hidden_dim, num_layers=2):
    """nn.Linear-style init; weights stored transposed (y = x @ W), f32."""
    keys = jax.random.split(key, 2 * num_layers + 2)
    s = 1.0 / jnp.sqrt(D)
    w_h = jnp.stack([jax.random.uniform(keys[2 * l], (D, D), jnp.float32, -s, s)
                     for l in range(num_layers)])
    b_h = jnp.stack([jax.random.uniform(keys[2 * l + 1], (1, D), jnp.float32, -s, s)
                     for l in range(num_layers)])
    wo = jax.random.uniform(keys[-2], (D, hidden_dim), jnp.float32, -s, s)
    bo = jax.random.uniform(keys[-1], (1, hidden_dim), jnp.float32, -s, s)
    return (w_h, b_h, wo, bo)


def dnn_reference(x, params, *, hidden_dim, num_layers=2, residual=True):
    """Plain-JAX reference (same bf16-weight / f32-accumulate numerics)."""
    b, m, d = x.shape
    w_h, b_h, wo, bo = params
    h = x.reshape(b, m * d).astype(jnp.float32)
    for l in range(num_layers):
        z = jnp.dot(h.astype(jnp.bfloat16), w_h[l].astype(jnp.bfloat16),
                    preferred_element_type=jnp.float32) + b_h[l]
        a = jnp.maximum(z, 0.0)
        h = a + h if residual else a
    return jnp.dot(h.astype(jnp.bfloat16), wo.astype(jnp.bfloat16),
                   preferred_element_type=jnp.float32) + bo


# --------------------------------------------------------------------------- #
# Self-test
# --------------------------------------------------------------------------- #

if __name__ == "__main__":
    key = jax.random.PRNGKey(0)

    configs = [
        # (batch, n_inputs, embedding_dim, hidden_dim, num_layers, residual)
        (8, 4, 32, 16, 2, True),    # D=128, lane-aligned, single batch tile
        (20, 3, 20, 16, 3, True),   # D=60 ragged -> padded; 2 batch tiles
    ]
    for (batch, n_inputs, embedding_dim, hidden_dim, num_layers, residual) in configs:
        D = n_inputs * embedding_dim
        kx, kp, key = jax.random.split(key, 3)
        x = jax.random.normal(kx, (batch, n_inputs, embedding_dim), jnp.float32)
        params = init_params(kp, D, hidden_dim, num_layers)
        packed = pack_params(params, hidden_dim=hidden_dim)
        ref = dnn_reference(x, params, hidden_dim=hidden_dim,
                            num_layers=num_layers, residual=residual)
        for stream in (False, True):   # exercise both kernel paths
            out = dnn_forward(x, packed, hidden_dim=hidden_dim,
                              num_layers=num_layers, residual=residual,
                              stream_layers=stream)
            out = jax.block_until_ready(out)
            assert out.shape == (batch, hidden_dim)
            err = float(jnp.max(jnp.abs(out - ref)))
            assert jnp.allclose(out, ref, atol=2e-3, rtol=2e-3), (stream, err)

    print("KERNEL_OK")
</pallas_src>

<mosaic_0001>
module attributes {stable_mosaic.version = 11 : i64} {
  func.func @_dnn_resident_kernel(%arg0: i32, %arg1: memref<8x128xf32, #tpu.memory_space<vmem>>, %arg2: memref<2x128x128xbf16, #tpu.memory_space<vmem>>, %arg3: memref<2x1x128xf32, #tpu.memory_space<vmem>>, %arg4: memref<128x128xbf16, #tpu.memory_space<vmem>>, %arg5: memref<1x128xf32, #tpu.memory_space<vmem>>, %arg6: memref<8x128xf32, #tpu.memory_space<vmem>>) attributes {dimension_semantics = [#tpu.dimension_semantics<parallel>], iteration_bounds = array<i64: 1>, scalar_prefetch = 0 : i64, scratch_operands = 0 : i64, tpu.core_type = #tpu.core_type<tc>, window_params = [{transform_indices = @transform_0, window_bounds = array<i64: 8, 128>}, {pipeline_mode = #tpu.pipeline_mode<synchronous>, transform_indices = @transform_1, window_bounds = array<i64: 2, 128, 128>}, {pipeline_mode = #tpu.pipeline_mode<synchronous>, transform_indices = @transform_2, window_bounds = array<i64: 2, 1, 128>}, {pipeline_mode = #tpu.pipeline_mode<synchronous>, transform_indices = @transform_3, window_bounds = array<i64: 128, 128>}, {pipeline_mode = #tpu.pipeline_mode<synchronous>, transform_indices = @transform_4, window_bounds = array<i64: 1, 128>}, {transform_indices = @transform_5, window_bounds = array<i64: 8, 128>}]} {
    %c0 = arith.constant 0 : index
    %c0_0 = arith.constant 0 : index
    %0 = vector.load %arg1[%c0, %c0_0] : memref<8x128xf32, #tpu.memory_space<vmem>>, vector<8x128xf32>
    %1 = arith.truncf %0 : vector<8x128xf32> to vector<8x128xbf16>
    %c0_1 = arith.constant 0 : index
    %c0_2 = arith.constant 0 : index
    %c0_3 = arith.constant 0 : index
    %2 = vector.load %arg2[%c0_1, %c0_2, %c0_3] : memref<2x128x128xbf16, #tpu.memory_space<vmem>>, vector<1x128x128xbf16>
    %3 = vector.shape_cast %2 : vector<1x128x128xbf16> to vector<128x128xbf16>
    %cst = arith.constant dense<0.000000e+00> : vector<8x128xf32>
    %4 = tpu.matmul %1, %3, %cst {dimension_numbers = #tpu.dot_dimension_numbers<[1], [0], [0], [1], [0, 0, 1, 1], [], []>} : vector<8x128xbf16>, vector<128x128xbf16>, vector<8x128xf32> -> vector<8x128xf32>
    %c0_4 = arith.constant 0 : index
    %c0_5 = arith.constant 0 : index
    %c0_6 = arith.constant 0 : index
    %5 = vector.load %arg3[%c0_4, %c0_5, %c0_6] : memref<2x1x128xf32, #tpu.memory_space<vmem>>, vector<1x1x128xf32>
    %6 = vector.shape_cast %5 : vector<1x1x128xf32> to vector<1x128xf32>
    %7 = vector.broadcast %6 : vector<1x128xf32> to vector<8x128xf32>
    %8 = arith.addf %4, %7 : vector<8x128xf32>
    %cst_7 = arith.constant 0.000000e+00 : f32
    %9 = vector.broadcast %cst_7 : f32 to vector<8x128xf32>
    %10 = arith.maximumf %8, %9 : vector<8x128xf32>
    %11 = arith.addf %10, %0 : vector<8x128xf32>
    %12 = arith.truncf %11 : vector<8x128xf32> to vector<8x128xbf16>
    %c1 = arith.constant 1 : index
    %c0_8 = arith.constant 0 : index
    %c0_9 = arith.constant 0 : index
    %13 = vector.load %arg2[%c1, %c0_8, %c0_9] : memref<2x128x128xbf16, #tpu.memory_space<vmem>>, vector<1x128x128xbf16>
    %14 = vector.shape_cast %13 : vector<1x128x128xbf16> to vector<128x128xbf16>
    %cst_10 = arith.constant dense<0.000000e+00> : vector<8x128xf32>
    %15 = tpu.matmul %12, %14, %cst_10 {dimension_numbers = #tpu.dot_dimension_numbers<[1], [0], [0], [1], [0, 0, 1, 1], [], []>} : vector<8x128xbf16>, vector<128x128xbf16>, vector<8x128xf32> -> vector<8x128xf32>
    %c1_11 = arith.constant 1 : index
    %c0_12 = arith.constant 0 : index
    %c0_13 = arith.constant 0 : index
    %16 = vector.load %arg3[%c1_11, %c0_12, %c0_13] : memref<2x1x128xf32, #tpu.memory_space<vmem>>, vector<1x1x128xf32>
    %17 = vector.shape_cast %16 : vector<1x1x128xf32> to vector<1x128xf32>
    %18 = vector.broadcast %17 : vector<1x128xf32> to vector<8x128xf32>
    %19 = arith.addf %15, %18 : vector<8x128xf32>
    %cst_14 = arith.constant 0.000000e+00 : f32
    %20 = vector.broadcast %cst_14 : f32 to vector<8x128xf32>
    %21 = arith.maximumf %19, %20 : vector<8x128xf32>
    %22 = arith.addf %21, %11 : vector<8x128xf32>
    %23 = arith.truncf %22 : vector<8x128xf32> to vector<8x128xbf16>
    %c0_15 = arith.constant 0 : index
    %c0_16 = arith.constant 0 : index
    %24 = vector.load %arg4[%c0_15, %c0_16] : memref<128x128xbf16, #tpu.memory_space<vmem>>, vector<128x128xbf16>
    %cst_17 = arith.constant dense<0.000000e+00> : vector<8x128xf32>
    %25 = tpu.matmul %23, %24, %cst_17 {dimension_numbers = #tpu.dot_dimension_numbers<[1], [0], [0], [1], [0, 0, 1, 1], [], []>} : vector<8x128xbf16>, vector<128x128xbf16>, vector<8x128xf32> -> vector<8x128xf32>
    %c0_18 = arith.constant 0 : index
    %c0_19 = arith.constant 0 : index
    %26 = vector.load %arg5[%c0_18, %c0_19] : memref<1x128xf32, #tpu.memory_space<vmem>>, vector<1x128xf32>
    %27 = vector.broadcast %26 : vector<1x128xf32> to vector<8x128xf32>
    %28 = arith.addf %25, %27 : vector<8x128xf32>
    %c0_20 = arith.constant 0 : index
    %c0_21 = arith.constant 0 : index
    %29 = vector.load %arg6[%c0_20, %c0_21] : memref<8x128xf32, #tpu.memory_space<vmem>>, vector<8x128xf32>
    tpu.vector_store %arg6[%c0_20, %c0_21], %28 {strides = array<i32>} : memref<8x128xf32, #tpu.memory_space<vmem>>, vector<8x128xf32>,
    return
  }
  func.func @transform_0(%arg0: i32) -> (i32, i32) {
    %c0_i32 = arith.constant 0 : i32
    %c0_i32_0 = arith.constant 0 : i32
    return %arg0, %c0_i32 : i32, i32
  }
  func.func @transform_1(%arg0: i32) -> (i32, i32, i32) {
    %c0_i32 = arith.constant 0 : i32
    %c0_i32_0 = arith.constant 0 : i32
    %c0_i32_1 = arith.constant 0 : i32
    %c0_i32_2 = arith.constant 0 : i32
    return %c0_i32, %c0_i32_0, %c0_i32_1 : i32, i32, i32
  }
  func.func @transform_2(%arg0: i32) -> (i32, i32, i32) {
    %c0_i32 = arith.constant 0 : i32
    %c0_i32_0 = arith.constant 0 : i32
    %c0_i32_1 = arith.constant 0 : i32
    %c0_i32_2 = arith.constant 0 : i32
    return %c0_i32, %c0_i32_0, %c0_i32_1 : i32, i32, i32
  }
  func.func @transform_3(%arg0: i32) -> (i32, i32) {
    %c0_i32 = arith.constant 0 : i32
    %c0_i32_0 = arith.constant 0 : i32
    %c0_i32_1 = arith.constant 0 : i32
    return %c0_i32, %c0_i32_0 : i32, i32
  }
  func.func @transform_4(%arg0: i32) -> (i32, i32) {
    %c0_i32 = arith.constant 0 : i32
    %c0_i32_0 = arith.constant 0 : i32
    %c0_i32_1 = arith.constant 0 : i32
    return %c0_i32, %c0_i32_0 : i32, i32
  }
  func.func @transform_5(%arg0: i32) -> (i32, i32) {
    %c0_i32 = arith.constant 0 : i32
    %c0_i32_0 = arith.constant 0 : i32
    return %arg0, %c0_i32 : i32, i32
  }
}

</mosaic_0001>

<bundles_post_ra>
// kernel: dnn_forward.1
= control target key start
LH: loop header
LB: loop body
LE: loop exit
PB: predicated region body
PF: predicated region fallthrough
CT: control target
= control target key end

     0   :  { %10 = vsyncpa [#allocation3], 0  ;;  %s710_s0 = inlined_call_operand.vmem [shape: f32[8,128], index: 0, kind: input, shape index: {}]   ;;  %s711_s1 = inlined_call_operand.hbm [shape: bf16[2,128,128], index: 1, kind: input, shape index: {}]   ;;  %s712_s2 = inlined_call_operand.vmem [shape: f32[2,1,128], index: 2, kind: input, shape index: {}]   ;;  %s713_s3 = inlined_call_operand.hbm [shape: bf16[128,128], index: 3, kind: input, shape index: {}]   ;;  %s714_s4 = inlined_call_operand.vmem [shape: f32[1,128], index: 4, kind: input, shape index: {}]   ;;  %s715_s5 = inlined_call_operand.hbm [shape: f32[8,128], index: 5, kind: output, shape index: {}]  }
   0x1   :  { %11 = vsyncpa [#allocation6], 0 }
   0x2   :  { %12 = vsyncpa [#allocation4], 0  ;;  %s622_s18 = smov [#allocation2]  }
   0x3   :  { %s20_s19 = sshll.u32 %s622_s18, 4  ;;  %s21_s19 = int_to_ptr.vmem [resolvable:$true] %s20_s19 }
   0x4   :  { %s564_s20 = scalar_lea.vmem %s21_s19, 2048  ;;  %p569_p1 = scmp.lt.s32.totalorder %s21_s19, %s21_s19 }
   0x5   :  { %p565_p0 = scmp.ne.s32.totalorder %s21_s19, %s564_s20  ;;  %p570_p2 = scmp.lt.s32.totalorder %s564_s20, %s564_s20 }
   0x7   :  { %p571_p3 = por %p570_p2, %p569_p1 }
   0x9   :  { %p572_p4 = pnand %p571_p3, %p565_p0 }
   0xb   :  { %575 = shalt.err (!%p572_p4)
}
   0xc   :  { %s623_s21 = smov 64   ;;  %s624_s22 = smov 4  }
   0xd   :  { %26 = dma.hbm_to_vmem [thread:$0]  %s711_s1, 2048, %s21_s19, [#allocation3], %s623_s21, %s623_s21, %s624_s22  }
   0xe   :  { %s625_s25 = smov [#allocation5]  }
   0xf   :  { %s34_s26 = sshll.u32 %s625_s25, 4  ;;  %s35_s26 = int_to_ptr.vmem [resolvable:$true] %s34_s26 }
  0x10   :  { %s584_s27 = scalar_lea.vmem %s35_s26, 1024  ;;  %p589_p6 = scmp.lt.s32.totalorder %s35_s26, %s35_s26 }
  0x11   :  { %p585_p5 = scmp.ne.s32.totalorder %s35_s26, %s584_s27  ;;  %p590_p7 = scmp.lt.s32.totalorder %s584_s27, %s584_s27 }
  0x13   :  { %p591_p8 = por %p590_p7, %p589_p6 }
  0x15   :  { %p592_p9 = pnand %p591_p8, %p585_p5 }
  0x17   :  { %595 = shalt.err (!%p592_p9)
}
  0x18   :  { %40 = dma.hbm_to_vmem [thread:$0]  %s713_s3, 1024, %s35_s26, [#allocation6], %s623_s21, %s623_s21, %s624_s22  }
  0x19   :  { %616 = dma.done.wait [#allocation3], 2048  }
  0x1a   :  { %617 = vsyncadd [#allocation3], 4294965248 }
  0x1b   :  { %618 = dma.done.wait [#allocation6], 1024  }
  0x1c   :  { %619 = vsyncadd [#allocation6], 4294966272  ;;  %v626_v0 = vmov 0.0   ;;  %vm627_vm0 = vmmov 0   ;;  %v532_v1 = vld [vmem:[#allocation2 + $0x38] sm:$0xff]   ;;  %v533_v2 = vld [vmem:[#allocation2 + $0x30] sm:$0xff]  }
  0x1d   :  { %465 = vmatprep.subr.bf16.mxu0 %v626_v0  ;;  %481 = vmatprep.mubr.msk.bf16.mxu0 %vm627_vm0, %v626_v0  ;;  %v534_v3 = vld [vmem:[#allocation2 + $0x28] sm:$0xff]   ;;  %v540_v4 = vld [vmem:[#allocation2 + $0x78] sm:$0xff]   ;;  %v535_v5 = vld [vmem:[#allocation2 + $0x20] sm:$0xff]   ;;  %s628_s10 = smov [#allocation7]  }
  0x1e   :  { %485 = vmatprep.subr.bf16.mxu1 %v626_v0  ;;  %501 = vmatprep.mubr.msk.bf16.mxu1 %vm627_vm0, %v626_v0  ;;  %v541_v6 = vld [vmem:[#allocation2 + $0x70] sm:$0xff]   ;;  %v536_v7 = vld [vmem:[#allocation2 + $0x18] sm:$0xff]   ;;  %v542_v8 = vld [vmem:[#allocation2 + $0x68] sm:$0xff]   ;;  %s400_s11 = sshll.u32 %s628_s10, 4  ;;  %s401_s11 = int_to_ptr.vmem [resolvable:$true] %s400_s11 }
  0x1f   :  { %466 = vmatpush3.bf16.msra.mxu0 %v532_v1  ;;  %486 = vmatpush3.bf16.msra.mxu1 %v540_v4  ;;  %v537_v9 = vld [vmem:[#allocation2 + $0x10] sm:$0xff]   ;;  %v543_v10 = vld [vmem:[#allocation2 + $0x60] sm:$0xff]   ;;  %v538_v11 = vld [vmem:[#allocation2 + $0x8] sm:$0xff]   ;;  %p601_p11 = scmp.lt.s32.totalorder %s401_s11, %s401_s11 }
  0x20   :  { %467 = vmatprep.subr.bf16.mxu0 %v626_v0  ;;  %487 = vmatprep.subr.bf16.mxu1 %v626_v0  ;;  %v544_v12 = vld [vmem:[#allocation2 + $0x58] sm:$0xff]   ;;  %v539_v13 = vld [vmem:[#allocation2] sm:$0xff]   ;;  %v545_v15 = vld [vmem:[#allocation2 + $0x50] sm:$0xff]  }
  0x21   :  { %v50_v14 = vld [vmem:[%s710_s0] sm:$0xff]  ;;  %v546_v17 = vld [vmem:[#allocation2 + $0x48] sm:$0xff]   ;;  %v548_v19 = vld [vmem:[#allocation5 + $0x38] sm:$0xff]  }
  0x22   :  { %v51_v16 = vpack.c.bf16 %v50_v14, %v50_v14  ;;  %v547_v18 = vld [vmem:[#allocation2 + $0x40] sm:$0xff]   ;;  %v549_v20 = vld [vmem:[#allocation5 + $0x30] sm:$0xff]   ;;  %v550_v21 = vld [vmem:[#allocation5 + $0x28] sm:$0xff]  }
  0x23   :  { %468 = vmatpush3.bf16.msra.mxu0 %v533_v2  ;;  %488 = vmatpush3.bf16.msra.mxu1 %v541_v6  ;;  %v551_v22 = vld [vmem:[#allocation5 + $0x20] sm:$0xff]   ;;  %v552_v23 = vld [vmem:[#allocation5 + $0x18] sm:$0xff]   ;;  %v553_v24 = vld [vmem:[#allocation5 + $0x10] sm:$0xff]  }
  0x24   :  { %469 = vmatprep.subr.bf16.mxu0 %v626_v0  ;;  %489 = vmatprep.subr.bf16.mxu1 %v626_v0  ;;  %v410_v25 = vld [vmem:[%s712_s2] ss:$0 sm:$0xff]  ;;  %v554_v34 = vld [vmem:[#allocation5 + $0x8] sm:$0xff]   ;;  %v420_v36 = vld [vmem:[%s712_s2 + $0x1] ss:$0 sm:$0xff]  ;;  %s596_s2 = scalar_lea.vmem %s401_s11, 128 }
  0x25   :  { %v555_v35 = vld [vmem:[#allocation5] sm:$0xff]   ;;  %p597_p10 = scmp.ne.s32.totalorder %s401_s11, %s596_s2  ;;  %p602_p12 = scmp.lt.s32.totalorder %s596_s2, %s596_s2 }
  0x26   :  { %v429_v45 = vld [vmem:[%s714_s4] ss:$0 sm:$0xff] }
  0x27   :  { %470 = vmatpush3.bf16.msra.mxu0 %v534_v3  ;;  %490 = vmatpush3.bf16.msra.mxu1 %v542_v8  ;;  %p603_p13 = por %p602_p12, %p601_p11 }
  0x28   :  { %471 = vmatprep.subr.bf16.mxu0 %v626_v0  ;;  %491 = vmatprep.subr.bf16.mxu1 %v626_v0 }
  0x29   :  { %p604_p0 = pnand %p603_p13, %p597_p10 }
  0x2b   :  { %472 = vmatpush3.bf16.msra.mxu0 %v535_v5  ;;  %492 = vmatpush3.bf16.msra.mxu1 %v543_v10 }
  0x2c   :  { %473 = vmatprep.subr.bf16.mxu0 %v626_v0  ;;  %493 = vmatprep.subr.bf16.mxu1 %v626_v0 }
  0x2f   :  { %474 = vmatpush3.bf16.msra.mxu0 %v536_v7  ;;  %494 = vmatpush3.bf16.msra.mxu1 %v544_v12 }
  0x30   :  { %475 = vmatprep.subr.bf16.mxu0 %v626_v0  ;;  %495 = vmatprep.subr.bf16.mxu1 %v626_v0 }
  0x33   :  { %476 = vmatpush3.bf16.msra.mxu0 %v537_v9  ;;  %496 = vmatpush3.bf16.msra.mxu1 %v545_v15 }
  0x34   :  { %477 = vmatprep.subr.bf16.mxu0 %v626_v0  ;;  %497 = vmatprep.subr.bf16.mxu1 %v626_v0 }
  0x37   :  { %478 = vmatpush3.bf16.msra.mxu0 %v538_v11  ;;  %498 = vmatpush3.bf16.msra.mxu1 %v546_v17 }
  0x38   :  { %479 = vmatprep.subr.bf16.mxu0 %v626_v0  ;;  %499 = vmatprep.subr.bf16.mxu1 %v626_v0 }
  0x3b   :  { %480 = vmatpush3.bf16.msra.mxu0 %v539_v13  ;;  %500 = vmatpush3.bf16.msra.mxu1 %v547_v18 }
  0x3c   :  { %505 = vmatprep.subr.bf16.mxu0 %v626_v0 }
  0x3e   :  { %482 = vmatmul.mubr.bf16.vlgmr.msra.gmra.mxu0 %v51_v16 }
  0x3f   :  { %521 = vmatprep.mubr.msk.bf16.mxu0 %vm627_vm0, %v626_v0  ;;  %506 = vmatpush3.bf16.msra.mxu0 %v548_v19 }
  0x40   :  { %507 = vmatprep.subr.bf16.mxu0 %v626_v0 }
  0x43   :  { %508 = vmatpush3.bf16.msra.mxu0 %v549_v20 }
  0x44   :  { %509 = vmatprep.subr.bf16.mxu0 %v626_v0 }
  0x47   :  { %510 = vmatpush3.bf16.msra.mxu0 %v550_v21 }
  0x48   :  { %511 = vmatprep.subr.bf16.mxu0 %v626_v0 }
  0x4b   :  { %512 = vmatpush3.bf16.msra.mxu0 %v551_v22 }
  0x4c   :  { %513 = vmatprep.subr.bf16.mxu0 %v626_v0 }
  0x4f   :  { %514 = vmatpush3.bf16.msra.mxu0 %v552_v23 }
  0x50   :  { %515 = vmatprep.subr.bf16.mxu0 %v626_v0 }
  0x53   :  { %516 = vmatpush3.bf16.msra.mxu0 %v553_v24 }
  0x54   :  { %517 = vmatprep.subr.bf16.mxu0 %v626_v0 }
  0x57   :  { %518 = vmatpush3.bf16.msra.mxu0 %v554_v34 }
  0x58   :  { %519 = vmatprep.subr.bf16.mxu0 %v626_v0 }
  0x5b   :  { %520 = vmatpush3.bf16.msra.mxu0 %v555_v35 }
  0xfe   :  { %v157_v26 = vpop.f32.mrf.mxu0 }
  0xff   :  { %v158_v27 = vadd.f32 %v410_v25, %v157_v26 }
 0x100   :  { %v483_v28 = vpop.f32.mrf.mxu0 }
 0x101   :  { %v163_v29 = vmax.f32 %v158_v27, 0.0 }
 0x102   :  { %v160_v30 = vpop.f32.mrf.mxu0 }
 0x103   :  { %v164_v31 = vadd.f32 %v163_v29, %v50_v14 }
 0x104   :  { %v484_v32 = vpop.f32.mrf.mxu0 }
 0x105   :  { %v165_v33 = vpack.c.bf16 %v164_v31, %v164_v31 }
 0x107   :  { %502 = vmatmul.mubr.bf16.vlgmr.msra.gmra.mxu1 %v165_v33 }
 0x1c7   :  { %v273_v37 = vpop.f32.mrf.mxu1 }
 0x1c8   :  { %v274_v38 = vadd.f32 %v420_v36, %v273_v37 }
 0x1c9   :  { %v503_v39 = vpop.f32.mrf.mxu1 }
 0x1ca   :  { %v279_v40 = vmax.f32 %v274_v38, 0.0 }
 0x1cb   :  { %v276_v41 = vpop.f32.mrf.mxu1 }
 0x1cc   :  { %v280_v42 = vadd.f32 %v279_v40, %v164_v31 }
 0x1cd   :  { %v504_v43 = vpop.f32.mrf.mxu1 }
 0x1ce   :  { %v281_v44 = vpack.c.bf16 %v280_v42, %v280_v42 }
 0x1d0   :  { %522 = vmatmul.mubr.bf16.vlgmr.msra.gmra.mxu0 %v281_v44 }
 0x290   :  { %v387_v46 = vpop.f32.mrf.mxu0 }
 0x291   :  { %v388_v47 = vadd.f32 %v429_v45, %v387_v46 }
 0x292   :  { %v523_v48 = vpop.f32.mrf.mxu0 }
 0x293   :  { %393 = vst [vmem:[#allocation7] sm:$0xff] %v388_v47 }
 0x294   :  { %v390_v49 = vpop.f32.mrf.mxu0 }
 0x295   :  { %607 = shalt.err (!%p604_p0)
}
 0x296   :  { %403 = dma.vmem_to_hbm [thread:$0]  %s401_s11, 128, %s715_s5, [#allocation4]   ;;  %v524_v50 = vpop.f32.mrf.mxu0 }
 0x297   :  { %620 = dma.done.wait [#allocation4], 128  }
 0x298   :  { %621 = vsyncadd [#allocation4], 4294967168 }
 0x299   :  { %407 = vsyncpa [#allocation3], 1 }
 0x29a   :  { %408 = vsyncpa [#allocation6], 1 }
 0x29b   :  { %409 = vsyncpa [#allocation4], 1 }

</bundles_post_ra>
